<compile_context>
chip_gen: v6e
topology: v6e:2x2x1
jax: 0.10.0
libtpu: 0.0.40
codegen_flags: <defaults>
</compile_context>

<pallas_src>
from functools import partial

import numpy as np
import jax
import jax.numpy as jnp
from jax.experimental import pallas as pl
from jax.experimental.pallas import tpu as pltpu


def _round_up(x, m):
    return ((x + m - 1) // m) * m


def _vmem_limit_bytes():
    """Generation-aware scoped-VMEM limit (v5e/v6e: 128 MiB phys, v7x: 64 MiB)."""
    try:
        cap = int(pltpu.get_tpu_info().vmem_capacity_bytes)
    except Exception:
        cap = 64 << 20  # conservative fallback (v7x-sized)
    return max(32 << 20, min(cap * 3 // 4, 112 << 20))


# ----------------------------------------------------------------------------
# Kernel 1: per-metapath path summarizer, all P metapaths handled per node tile.
#   s_partial[s, p] = sum_{node tiles of split s} tanh(h[p, n, :] @ W[p] + b[p])
# grid = (split, tiles) -- leading axis is "parallel" (both v7x TensorCores),
# trailing axis is the node-tile reduction. The (P, hidden) output block is
# resident across the reduction and used directly as the accumulator.
# Padded (zero) h rows contribute tanh(b) each; corrected exactly in glue.
# ----------------------------------------------------------------------------
def _summarize_kernel(h_ref, w_ref, b_ref, s_ref):
    # h_ref: (P, tn, D) bf16, w_ref: (P, D, H) bf16, b_ref: (P, 1, H) f32,
    # s_ref: (P, H) f32 (split dim squeezed out by the BlockSpec).
    @pl.when(pl.program_id(1) == 0)
    def _():
        s_ref[...] = jnp.zeros_like(s_ref)

    P = h_ref.shape[0]
    for p in range(P):  # P is tiny and static -> unrolled
        z = jnp.dot(h_ref[p], w_ref[p], preferred_element_type=jnp.float32)
        t = jnp.tanh(z + b_ref[p])            # (tn, H) f32
        s_ref[p, :] += jnp.sum(t, axis=0)     # per-row accumulate (no concat/XLU)


def path_summarize(h_pad, w_sum, b_sum, tn, tiles, split, vmem_limit):
    """h_pad (P, N_pad, D) bf16 -> (split, P, hidden) f32 partial sums of tanh(h@W+b)."""
    P, n_pad, D = h_pad.shape
    H = w_sum.shape[-1]
    return pl.pallas_call(
        _summarize_kernel,
        out_shape=jax.ShapeDtypeStruct((split, P, H), jnp.float32),
        grid_spec=pltpu.PrefetchScalarGridSpec(
            num_scalar_prefetch=0,
            grid=(split, tiles),
            in_specs=[
                pl.BlockSpec((P, tn, D), lambda s, n: (0, s * tiles + n, 0)),
                pl.BlockSpec((P, D, H), lambda s, n: (0, 0, 0)),
                pl.BlockSpec((P, 1, H), lambda s, n: (0, 0, 0)),
            ],
            out_specs=pl.BlockSpec((None, P, H), lambda s, n: (s, 0, 0)),
        ),
        compiler_params=pltpu.CompilerParams(
            dimension_semantics=("parallel", "arbitrary"),
            vmem_limit_bytes=vmem_limit,
        ),
    )(h_pad, w_sum, b_sum[:, None, :])


# ----------------------------------------------------------------------------
# Kernel 2: beta-weighted combination over metapaths + output linear + ReLU.
#   out[n] = relu( (sum_p beta[p] * h[p, n, :]) @ W_out + b_out )
# grid = (N_pad // tn,), fully "parallel": each step loads one (P, tn, D) bf16
# slab, forms the f32 mix, and runs the output matmul + ReLU (no scratch).
# ----------------------------------------------------------------------------
def _combine_kernel(h_ref, beta_ref, w_ref, b_ref, o_ref):
    # h_ref: (P, tn, D) bf16, beta_ref: SMEM (P,) f32, w_ref: (D, H) bf16,
    # b_ref: (1, H) f32, o_ref: (tn, H) f32
    P = h_ref.shape[0]
    mixed = beta_ref[0] * h_ref[0]          # f32 (beta is f32 -> upcasts h)
    for p in range(1, P):                   # static, tiny
        mixed = mixed + beta_ref[p] * h_ref[p]
    out = jnp.dot(mixed.astype(jnp.bfloat16), w_ref[...],
                  preferred_element_type=jnp.float32) + b_ref[...]
    o_ref[...] = jnp.maximum(out, 0.0)


def combine_and_project(h_pad, beta, w_out, b_out, tn, vmem_limit):
    P, n_pad, D = h_pad.shape
    H = w_out.shape[-1]
    return pl.pallas_call(
        _combine_kernel,
        out_shape=jax.ShapeDtypeStruct((n_pad, H), jnp.float32),
        grid_spec=pltpu.PrefetchScalarGridSpec(
            num_scalar_prefetch=0,
            grid=(n_pad // tn,),
            in_specs=[
                pl.BlockSpec((P, tn, D), lambda n: (0, n, 0)),
                pl.BlockSpec(memory_space=pltpu.MemorySpace.SMEM),
                pl.BlockSpec((D, H), lambda n: (0, 0)),
                pl.BlockSpec((1, H), lambda n: (0, 0)),
            ],
            out_specs=pl.BlockSpec((tn, H), lambda n: (n, 0)),
        ),
        compiler_params=pltpu.CompilerParams(
            dimension_semantics=("parallel",),
            vmem_limit_bytes=vmem_limit,
        ),
    )(h_pad, beta, w_out, b_out.reshape(1, H))


# ----------------------------------------------------------------------------
# Parameter setup + module wrapper
# ----------------------------------------------------------------------------
def _init_linear(key, fan_in, fan_out, bias=True):
    kw, kb = jax.random.split(key)
    bound = 1.0 / np.sqrt(fan_in)
    w = jax.random.uniform(kw, (fan_in, fan_out), jnp.float32, -bound, bound)
    b = (
        jax.random.uniform(kb, (fan_out,), jnp.float32, -bound, bound)
        if bias
        else None
    )
    return w, b


class InterMetaPathAggregatorPallas:
    """JAX/Pallas port of InterMetaPathAggregator (intra aggregator_type='mean')."""

    def __init__(self, hidden_size, metapath_map, num_head=1, key=None):
        self.hidden_size = hidden_size
        self.metapath_map = metapath_map
        self.num_head = num_head
        D = hidden_size * num_head
        self.w_sum, self.b_sum, self.a_attn = {}, {}, {}
        self.w_out, self.b_out = {}, {}
        i = 0
        for node_type, metapaths in metapath_map.items():
            for mp in metapaths:
                w, b = _init_linear(jax.random.fold_in(key, i), D, hidden_size)
                i += 1
                self.w_sum[(node_type, mp)] = w  # path_summarizer weight (D, hidden)
                self.b_sum[(node_type, mp)] = b  # path_summarizer bias   (hidden,)
                aw, _ = _init_linear(
                    jax.random.fold_in(key, i), hidden_size, 1, bias=False
                )
                i += 1
                self.a_attn[(node_type, mp)] = aw[:, 0]  # path_attn weight (hidden,)
            w, b = _init_linear(jax.random.fold_in(key, i), D, hidden_size)
            i += 1
            self.w_out[node_type] = w  # output_linear weight (D, hidden)
            self.b_out[node_type] = b  # output_linear bias   (hidden,)

    # ---- IntraMetaPathAggregator (aggregator_type='mean') -------------------
    def _intra(self, node_features, edge_index, metapath_idx):
        # F.embedding(metapath_idx, node_features) -> (E, L, hidden)
        mp_feat = jnp.take(node_features, metapath_idx, axis=0)
        agg = jnp.mean(mp_feat, axis=1)                         # (E, hidden)
        agg = jnp.concatenate([agg] * self.num_head, axis=-1)   # (E, D)
        # TODO(synk): MultiHeadEdgeAttention is not defined in the reference source;
        # use a deterministic mean-scatter of edge features onto edge_index[1] nodes.
        dst = edge_index[1]
        n = node_features.shape[0]
        summed = jax.ops.segment_sum(agg, dst, num_segments=n)
        cnt = jax.ops.segment_sum(
            jnp.ones_like(dst, dtype=jnp.float32), dst, num_segments=n
        )
        return summed / jnp.maximum(cnt, 1.0)[:, None]          # (num_nodes, D)

    # ---- tile sizing ---------------------------------------------------------
    @staticmethod
    def _tile_params(n_sel, P, D, H, split, vmem_limit):
        """Pick the node-tile size tn (multiple of 16, bf16 sublane) so that the
        double-buffered h slab PLUS the double-buffered weight stack fit the
        generation-aware VMEM budget."""
        per_split = -(-n_sel // split)
        tn = min(1024, _round_up(per_split, 16))
        budget = int(vmem_limit * 0.8)

        def vmem_bytes(t):
            return (2 * P * t * D * 2      # h slab, bf16, double-buffered
                    + 2 * P * D * H * 2    # summarizer weight stack, bf16, 2 bufs
                    + 2 * t * H * 4        # kernel-2 f32 output tile, 2 bufs
                    + 4 * P * H * 4)       # biases + resident s_sum blocks

        while tn > 16 and vmem_bytes(tn) > budget:
            tn = max(16, ((tn // 2) // 16) * 16)
        tiles = -(-per_split // tn)
        n_pad = split * tiles * tn
        return tn, n_pad, tiles

    # ---- forward ------------------------------------------------------------
    def __call__(self, node_features, metapath_graph, node_type_map, batch_node_ids):
        num_nodes = node_features.shape[0]
        node_ids = np.arange(num_nodes)
        vmem_limit = _vmem_limit_bytes()
        outputs = {}
        for node_type, intra_node_graphs in metapath_graph.items():
            node_type_mask = node_type_map[node_type]
            sel = np.where(
                np.logical_and(
                    node_type_mask == node_type, np.isin(node_ids, batch_node_ids)
                )
            )[0]
            n_sel = int(sel.shape[0])
            if n_sel == 0:  # nothing selected for this node type
                outputs[node_type] = jnp.zeros((0, self.hidden_size), jnp.float32)
                continue

            h_list, w_list, b_list, a_list = [], [], [], []
            for metapath, (edge_index, metapath_idx) in intra_node_graphs.items():
                mnf = self._intra(node_features, edge_index, metapath_idx)
                h_list.append(mnf[sel])                                  # (N_sel, D)
                w_list.append(self.w_sum[(node_type, metapath)])
                b_list.append(self.b_sum[(node_type, metapath)])
                a_list.append(self.a_attn[(node_type, metapath)])

            # bf16 at the HBM/MXU boundary; biases / attention vector stay f32.
            h_stack = jnp.stack(h_list, axis=0).astype(jnp.bfloat16)  # (P, N_sel, D)
            w_stack = jnp.stack(w_list, axis=0).astype(jnp.bfloat16)  # (P, D, hidden)
            b_stack = jnp.stack(b_list, axis=0)                       # (P, hidden) f32
            a_stack = jnp.stack(a_list, axis=0)                       # (P, hidden) f32

            P, _, D = h_stack.shape
            split = 2  # shards the summarize reduction across both v7x TCs; ~free on 1-TC chips
            tn, n_pad, tiles = self._tile_params(
                n_sel, P, D, self.hidden_size, split, vmem_limit
            )
            if n_pad != n_sel:
                h_stack = jnp.pad(h_stack, ((0, 0), (0, n_pad - n_sel), (0, 0)))

            # Pallas kernel 1: per-metapath sum of tanh(Linear), 2-way node split.
            partials = path_summarize(
                h_stack, w_stack, b_stack, tn, tiles, split, vmem_limit
            )                                                          # (split, P, hidden)
            # Each zero-padded row contributed tanh(b); correction is exact
            # because the pad value is exactly 0.
            s_sum = jnp.sum(partials, axis=0) - float(n_pad - n_sel) * jnp.tanh(b_stack)
            s_mean = s_sum / float(n_sel)
            # Tiny per-metapath attention + softmax over P (glue).
            e = jnp.sum(s_mean * a_stack, axis=-1)                     # (P,)
            beta = jax.nn.softmax(e, axis=0).astype(jnp.float32)       # (P,)

            # Pallas kernel 2: weighted metapath sum + output linear + ReLU (fused).
            out_pad = combine_and_project(
                h_stack, beta,
                self.w_out[node_type].astype(jnp.bfloat16),
                self.b_out[node_type], tn, vmem_limit,
            )                                                          # (n_pad, hidden)
            # NOTE: padded rows hold relu(b_out) (nonzero) -- always slice them off.
            outputs[node_type] = out_pad[:n_sel]
        return outputs


# ----------------------------------------------------------------------------
# Pure-JAX f32 reference (same params, same placeholder intra aggregation)
# ----------------------------------------------------------------------------
def reference_forward(model, node_features, metapath_graph, node_type_map, batch_node_ids):
    num_nodes = node_features.shape[0]
    node_ids = np.arange(num_nodes)
    outputs = {}
    for node_type, graphs in metapath_graph.items():
        mask = node_type_map[node_type]
        sel = np.where(
            np.logical_and(mask == node_type, np.isin(node_ids, batch_node_ids))
        )[0]
        h_list, e_list = [], []
        for metapath, (edge_index, metapath_idx) in graphs.items():
            mnf = model._intra(node_features, edge_index, metapath_idx)
            h_p = mnf[sel]
            s_p = jnp.tanh(
                h_p @ model.w_sum[(node_type, metapath)]
                + model.b_sum[(node_type, metapath)]
            ).mean(axis=0)
            e_list.append(jnp.sum(s_p * model.a_attn[(node_type, metapath)]))
            h_list.append(h_p)
        h_stack = jnp.stack(h_list, axis=0)
        beta = jax.nn.softmax(jnp.stack(e_list), axis=0)
        h_a = jnp.sum(h_stack * beta[:, None, None], axis=0)
        outputs[node_type] = jax.nn.relu(
            h_a @ model.w_out[node_type] + model.b_out[node_type]
        )
    return outputs


# ----------------------------------------------------------------------------
if __name__ == "__main__":
    key = jax.random.PRNGKey(0)

    num_nodes = 48
    hidden = 128
    num_head = 2
    E = 32  # metapath instances per metapath graph

    metapath_map = {
        "M": [("M", "S", "M"), ("M", "S", "S", "M")],
        "S": [("S", "M", "S"), ("S", "M", "M", "S")],
    }
    # node type assignment: nodes 0..23 are 'M', nodes 24..47 are 'S'
    type_labels = np.array(["M"] * 24 + ["S"] * 24)
    node_type_map = {"M": type_labels, "S": type_labels}
    batch_node_ids = np.concatenate([np.arange(0, 16), np.arange(24, 40)])

    node_features = jax.random.normal(
        jax.random.fold_in(key, 1000), (num_nodes, hidden), jnp.float32
    )

    metapath_graph = {}
    c = 0
    for node_type, metapaths in metapath_map.items():
        metapath_graph[node_type] = {}
        for mp in metapaths:
            k_e = jax.random.fold_in(key, 2000 + c)
            k_i = jax.random.fold_in(key, 3000 + c)
            c += 1
            edge_index = jax.random.randint(k_e, (2, E), 0, num_nodes, jnp.int32)
            metapath_idx = jax.random.randint(k_i, (E, len(mp)), 0, num_nodes, jnp.int32)
            metapath_graph[node_type][mp] = (edge_index, metapath_idx)

    model = InterMetaPathAggregatorPallas(
        hidden_size=hidden,
        metapath_map=metapath_map,
        num_head=num_head,
        key=jax.random.fold_in(key, 7),
    )

    outputs = model(node_features, metapath_graph, node_type_map, batch_node_ids)
    outputs = {k: jax.block_until_ready(v) for k, v in outputs.items()}

    ref = reference_forward(
        model, node_features, metapath_graph, node_type_map, batch_node_ids
    )
    # Tolerance loosened vs the pure-f32 version: the dominant streams are cast
    # to bf16 at the MXU boundary (accumulation stays f32).
    for node_type in outputs:
        np.testing.assert_allclose(
            np.asarray(outputs[node_type]),
            np.asarray(ref[node_type]),
            rtol=2e-2,
            atol=2e-2,
        )

    print("KERNEL_OK")
</pallas_src>

<mosaic_0001>
module attributes {stable_mosaic.version = 11 : i64} {
  func.func @_summarize_kernel(%arg0: i32, %arg1: i32, %arg2: memref<2x16x256xbf16, #tpu.memory_space<vmem>>, %arg3: memref<2x256x128xbf16, #tpu.memory_space<vmem>>, %arg4: memref<2x1x128xf32, #tpu.memory_space<vmem>>, %arg5: memref<1x2x128xf32, #tpu.memory_space<vmem>>) attributes {dimension_semantics = [#tpu.dimension_semantics<parallel>, #tpu.dimension_semantics<arbitrary>], iteration_bounds = array<i64: 2, 1>, scalar_prefetch = 0 : i64, scratch_operands = 0 : i64, tpu.core_type = #tpu.core_type<tc>, window_params = [{transform_indices = @transform_0, window_bounds = array<i64: 2, 16, 256>}, {pipeline_mode = #tpu.pipeline_mode<synchronous>, transform_indices = @transform_1, window_bounds = array<i64: 2, 256, 128>}, {pipeline_mode = #tpu.pipeline_mode<synchronous>, transform_indices = @transform_2, window_bounds = array<i64: 2, 1, 128>}, {transform_indices = @transform_3, window_bounds = array<i64: 1, 2, 128>}]} {
    %c0_i32 = arith.constant 0 : i32
    %0 = arith.cmpi eq, %arg1, %c0_i32 : i32
    %1 = arith.extui %0 : i1 to i32
    %c0_i32_0 = arith.constant 0 : i32
    %2 = arith.cmpi ne, %1, %c0_i32_0 : i32
    scf.if %2 {
      %cst_32 = arith.constant 0.000000e+00 : f32
      %37 = vector.broadcast %cst_32 : f32 to vector<2x128xf32>
      %c0_33 = arith.constant 0 : index
      %c0_34 = arith.constant 0 : index
      %c0_35 = arith.constant 0 : index
      %38 = vector.load %arg5[%c0_33, %c0_34, %c0_35] : memref<1x2x128xf32, #tpu.memory_space<vmem>>, vector<1x2x128xf32>
      %39 = vector.shape_cast %38 : vector<1x2x128xf32> to vector<2x128xf32>
      %40 = vector.shape_cast %37 : vector<2x128xf32> to vector<1x2x128xf32>
      tpu.vector_store %arg5[%c0_33, %c0_34, %c0_35], %40 {strides = array<i32>} : memref<1x2x128xf32, #tpu.memory_space<vmem>>, vector<1x2x128xf32>,
    } else {
    }
    %c0 = arith.constant 0 : index
    %c0_1 = arith.constant 0 : index
    %c0_2 = arith.constant 0 : index
    %3 = vector.load %arg2[%c0, %c0_1, %c0_2] : memref<2x16x256xbf16, #tpu.memory_space<vmem>>, vector<1x16x256xbf16>
    %4 = vector.shape_cast %3 : vector<1x16x256xbf16> to vector<16x256xbf16>
    %c0_3 = arith.constant 0 : index
    %c0_4 = arith.constant 0 : index
    %c0_5 = arith.constant 0 : index
    %5 = vector.load %arg3[%c0_3, %c0_4, %c0_5] : memref<2x256x128xbf16, #tpu.memory_space<vmem>>, vector<1x256x128xbf16>
    %6 = vector.shape_cast %5 : vector<1x256x128xbf16> to vector<256x128xbf16>
    %cst = arith.constant dense<0.000000e+00> : vector<16x128xf32>
    %7 = tpu.matmul %4, %6, %cst {dimension_numbers = #tpu.dot_dimension_numbers<[1], [0], [0], [1], [0, 0, 1, 1], [], []>} : vector<16x256xbf16>, vector<256x128xbf16>, vector<16x128xf32> -> vector<16x128xf32>
    %c0_6 = arith.constant 0 : index
    %c0_7 = arith.constant 0 : index
    %c0_8 = arith.constant 0 : index
    %8 = vector.load %arg4[%c0_6, %c0_7, %c0_8] : memref<2x1x128xf32, #tpu.memory_space<vmem>>, vector<1x1x128xf32>
    %9 = vector.shape_cast %8 : vector<1x1x128xf32> to vector<1x128xf32>
    %10 = vector.broadcast %9 : vector<1x128xf32> to vector<16x128xf32>
    %11 = arith.addf %7, %10 : vector<16x128xf32>
    %12 = math.tanh %11 : vector<16x128xf32>
    %c0_9 = arith.constant 0 : index
    %c0_10 = arith.constant 0 : index
    %c0_11 = arith.constant 0 : index
    %13 = vector.load %arg5[%c0_9, %c0_10, %c0_11] : memref<1x2x128xf32, #tpu.memory_space<vmem>>, vector<1x1x128xf32>
    %14 = vector.shape_cast %13 : vector<1x1x128xf32> to vector<128xf32>
    %cst_12 = arith.constant dense<0.000000e+00> : vector<128xf32>
    %15 = vector.multi_reduction <add>, %12, %cst_12 [0] : vector<16x128xf32> to vector<128xf32>
    %16 = arith.addf %14, %15 : vector<128xf32>
    %c0_13 = arith.constant 0 : index
    %c0_14 = arith.constant 0 : index
    %c0_15 = arith.constant 0 : index
    %17 = vector.load %arg5[%c0_13, %c0_14, %c0_15] : memref<1x2x128xf32, #tpu.memory_space<vmem>>, vector<1x1x128xf32>
    %18 = vector.shape_cast %17 : vector<1x1x128xf32> to vector<128xf32>
    %19 = vector.shape_cast %16 : vector<128xf32> to vector<1x1x128xf32>
    tpu.vector_store %arg5[%c0_13, %c0_14, %c0_15], %19 {strides = array<i32>} : memref<1x2x128xf32, #tpu.memory_space<vmem>>, vector<1x1x128xf32>,
    %c1 = arith.constant 1 : index
    %c0_16 = arith.constant 0 : index
    %c0_17 = arith.constant 0 : index
    %20 = vector.load %arg2[%c1, %c0_16, %c0_17] : memref<2x16x256xbf16, #tpu.memory_space<vmem>>, vector<1x16x256xbf16>
    %21 = vector.shape_cast %20 : vector<1x16x256xbf16> to vector<16x256xbf16>
    %c1_18 = arith.constant 1 : index
    %c0_19 = arith.constant 0 : index
    %c0_20 = arith.constant 0 : index
    %22 = vector.load %arg3[%c1_18, %c0_19, %c0_20] : memref<2x256x128xbf16, #tpu.memory_space<vmem>>, vector<1x256x128xbf16>
    %23 = vector.shape_cast %22 : vector<1x256x128xbf16> to vector<256x128xbf16>
    %cst_21 = arith.constant dense<0.000000e+00> : vector<16x128xf32>
    %24 = tpu.matmul %21, %23, %cst_21 {dimension_numbers = #tpu.dot_dimension_numbers<[1], [0], [0], [1], [0, 0, 1, 1], [], []>} : vector<16x256xbf16>, vector<256x128xbf16>, vector<16x128xf32> -> vector<16x128xf32>
    %c1_22 = arith.constant 1 : index
    %c0_23 = arith.constant 0 : index
    %c0_24 = arith.constant 0 : index
    %25 = vector.load %arg4[%c1_22, %c0_23, %c0_24] : memref<2x1x128xf32, #tpu.memory_space<vmem>>, vector<1x1x128xf32>
    %26 = vector.shape_cast %25 : vector<1x1x128xf32> to vector<1x128xf32>
    %27 = vector.broadcast %26 : vector<1x128xf32> to vector<16x128xf32>
    %28 = arith.addf %24, %27 : vector<16x128xf32>
    %29 = math.tanh %28 : vector<16x128xf32>
    %c0_25 = arith.constant 0 : index
    %c1_26 = arith.constant 1 : index
    %c0_27 = arith.constant 0 : index
    %30 = vector.load %arg5[%c0_25, %c1_26, %c0_27] : memref<1x2x128xf32, #tpu.memory_space<vmem>>, vector<1x1x128xf32>
    %31 = vector.shape_cast %30 : vector<1x1x128xf32> to vector<128xf32>
    %cst_28 = arith.constant dense<0.000000e+00> : vector<128xf32>
    %32 = vector.multi_reduction <add>, %29, %cst_28 [0] : vector<16x128xf32> to vector<128xf32>
    %33 = arith.addf %31, %32 : vector<128xf32>
    %c0_29 = arith.constant 0 : index
    %c1_30 = arith.constant 1 : index
    %c0_31 = arith.constant 0 : index
    %34 = vector.load %arg5[%c0_29, %c1_30, %c0_31] : memref<1x2x128xf32, #tpu.memory_space<vmem>>, vector<1x1x128xf32>
    %35 = vector.shape_cast %34 : vector<1x1x128xf32> to vector<128xf32>
    %36 = vector.shape_cast %33 : vector<128xf32> to vector<1x1x128xf32>
    tpu.vector_store %arg5[%c0_29, %c1_30, %c0_31], %36 {strides = array<i32>} : memref<1x2x128xf32, #tpu.memory_space<vmem>>, vector<1x1x128xf32>,
    return
  }
  func.func @transform_0(%arg0: i32, %arg1: i32) -> (i32, i32, i32) {
    %c1_i32 = arith.constant 1 : i32
    %0 = arith.muli %arg0, %c1_i32 : i32
    %1 = arith.addi %0, %arg1 : i32
    %c0_i32 = arith.constant 0 : i32
    %c0_i32_0 = arith.constant 0 : i32
    %c0_i32_1 = arith.constant 0 : i32
    return %c0_i32, %1, %c0_i32_0 : i32, i32, i32
  }
  func.func @transform_1(%arg0: i32, %arg1: i32) -> (i32, i32, i32) {
    %c0_i32 = arith.constant 0 : i32
    %c0_i32_0 = arith.constant 0 : i32
    %c0_i32_1 = arith.constant 0 : i32
    %c0_i32_2 = arith.constant 0 : i32
    return %c0_i32, %c0_i32_0, %c0_i32_1 : i32, i32, i32
  }
  func.func @transform_2(%arg0: i32, %arg1: i32) -> (i32, i32, i32) {
    %c0_i32 = arith.constant 0 : i32
    %c0_i32_0 = arith.constant 0 : i32
    %c0_i32_1 = arith.constant 0 : i32
    %c0_i32_2 = arith.constant 0 : i32
    return %c0_i32, %c0_i32_0, %c0_i32_1 : i32, i32, i32
  }
  func.func @transform_3(%arg0: i32, %arg1: i32) -> (i32, i32, i32) {
    %c0_i32 = arith.constant 0 : i32
    %c0_i32_0 = arith.constant 0 : i32
    %c0_i32_1 = arith.constant 0 : i32
    return %arg0, %c0_i32, %c0_i32_0 : i32, i32, i32
  }
}

</mosaic_0001>

<bundles_post_ra>
// kernel: tpu_custom_call.1
= control target key start
LH: loop header
LB: loop body
LE: loop exit
PB: predicated region body
PF: predicated region fallthrough
CT: control target
= control target key end

     0   :  { %s1325_s0 = inlined_call_operand.hbm [shape: bf16[2,32,256], index: 0, kind: input, shape index: {}]   ;;  %s1326_s1 = inlined_call_operand.hbm [shape: bf16[2,256,128], index: 1, kind: input, shape index: {}]   ;;  %s1327_s2 = inlined_call_operand.vmem [shape: f32[2,1,128], index: 2, kind: input, shape index: {}]   ;;  %s1328_s3 = inlined_call_operand.hbm [shape: f32[2,2,128], index: 3, kind: output, shape index: {}]  }
   0x1   :  { %1331 = sst [smem:[#allocation14_spill]] %s1326_s1 }
   0x2   :  { %8 = vsyncpa [#allocation3], 0 }
   0x3   :  { %10 = vsyncpa [#allocation3 + $0x1], 0 }
   0x4   :  { %11 = vsyncpa [#allocation6], 0 }
   0x5   :  { %12 = vsyncpa [#allocation4], 0 }
   0x6   :  { %14 = vsyncpa [#allocation4 + $0x1], 0  ;;  %s1138_s12 = smov 0   ;;  %s1140_s13 = smov 0  }
   0x7   :  { %s1142_s14 = smov 0   ;;  %s1144_s15 = smov 0  }
   0x8   :  { %s1146_s16 = smov 0   ;;  %s1148_s17 = smov 0  }
   0x9 LB: > { %s759_s18 = sadd.s32 4294967295, %s1105_s17   ;;  %s760_s19 = sadd.s32 4294967294, %s1105_s17   ;;  %s1105_s17 = sphi %s1148_s17, %s20_s17   ;;  %s1101_s16 = sphi %s1146_s16, %s1346_s16   ;;  %s1097_s15 = sphi %s1144_s15, %s1345_s15   ;;  %s1093_s14 = sphi %s1142_s14, %s1344_s14   ;;  %s1089_s13 = sphi %s1140_s13, %s1343_s13   ;;  %s1085_s12 = sphi %s1138_s12, %s1342_s12  }
   0xa   : > { %s32_s20 = sadd.s32 1, %s1101_s16  ;;  %s41_s21 = sadd.s32 1, %s1093_s14 }
   0xb   : > { %p34_p0 = scmp.ge.s32.totalorder %s32_s20, 2  ;;  %p48_p1 = scmp.ne.s32.totalorder %s1093_s14, %s1089_s13 }
   0xc   : > { %p49_p2 = scmp.eq.s32.totalorder %s1105_s17, 0  ;;  %p54_p3 = scmp.ne.s32.totalorder %s1089_s13, %s1085_s12 }
   0xd   : > { %s1348_s20 = smov (%p34_p0, %s32_s20), 0  ;;  %p1183_p5 = scmp.eq.s32.totalorder %s759_s18, 0 }
   0xe   : > { %p1179_p4 = por %p49_p2, %p48_p1  ;;  %s38_s24 = ssub.s32 %s1101_s16, %s1348_s20 }
   0xf   : > { %p120_p6 = scmp.eq.s32.totalorder %s759_s18, 1  ;;  %p39_p7 = scmp.eq.s32.totalorder %s38_s24, 0 }
  0x10   : > { %p1191_p8 = por %p1183_p5, %p54_p3  ;;  %p126_p10 = scmp.eq.s32.totalorder %s760_s19, 1 }
  0x11   : > { %p1195_p9 = por %p120_p6, %p48_p1  ;;  %p761_p12 = scmp.ge.s32.totalorder %s1105_s17, 1 }
  0x12   : > { %s1334_s25 = scalar_select %p1191_p8, 1, 0 }
  0x13   : > { %s1335_s26 = scalar_select %p1195_p9, 1, 0 }
  0x14   : > { %s1200_s27 = scalar_select %p39_p7, %s1093_s14, %s41_s21  }
  0x15   : > { %p1202_p11 = por %p126_p10, %p54_p3  ;;  %p133_p13 = scmp.lt.s32.totalorder %s1105_s17, 3 }
  0x16   : > { %s1107_s30 = smov [#allocation5]  }
  0x17   : > { %s1336_s28 = scalar_select %p1202_p11, 1, 0 }
  0x18   : > { %p1208_p0 = pnand %p761_p12, %p133_p13  ;;  %s145_s4 = sshll.u32 %s1107_s30, 4  ;;  %s146_s4 = int_to_ptr.vmem [resolvable:$true] %s145_s4 }
  0x19   : > { %s1006_s5 = scalar_lea.vmem %s146_s4, 4096  ;;  %p1014_p11 = scmp.lt.s32.totalorder %s146_s4, %s146_s4 }
  0x1a   : > { %p880_p1 = pneg %p1208_p0  ;;  %p1007_p3 = scmp.ne.s32.totalorder %s146_s4, %s1006_s5 }
  0x1b   : > { %p1015_p9 = scmp.lt.s32.totalorder %s1006_s5, %s1006_s5 }
  0x1c   : > { %p881_p2 = pnand %p880_p1, %p1183_p5 }
  0x1d   : > { %p1016_p8 = por %p1015_p9, %p1014_p11 }
  0x1e   : > { %p997_p6 = pneg %p881_p2 }
  0x20   : > { %p1009_p7 = pnand %p1007_p3, %p997_p6 }
  0x22   : > { %p1010_p10 = pneg %p1009_p7 }
  0x24   : > { %p1017_p12 = pnand %p1016_p8, %p1010_p10 }
  0x26   : > { %1020 = shalt.err (!%p1017_p12)
}
  0x27   : > { %s1108_s6 = smov 64   ;;  %s1109_s7 = smov 4  }
  0x28   : > { %s1338_s1 = sld [smem:[#allocation14_spill]]  ;;  %p763_p13 = scmp.ge.s32.totalorder %s1105_s17, 2 }
  0x2a   : > { %158 = sbr.rel (%p763_p13) target bundleno = 60 (0x3c), region = 24 }
  0x2e   : > { %883 = dma.hbm_to_vmem [thread:$0]  (!%p881_p2), %s1338_s1, 4096, %s146_s4, [#allocation6], %s1108_s6, %s1108_s6, %s1109_s7  }
  0x2f   : > { %s162_s10 = sand.u32 1, %s1093_s14   ;;  %s820_s11 = sshll.u32 %s1101_s16, 8 }
  0x30   : > { %s764_s18 = sshll.u32 %s162_s10, 5  ;;  %s174_s24 = scalar_lea.hbm %s1325_s0, %s820_s11 }
  0x31   : > { %s867_s30 = scalar_select %p1179_p4, [#allocation0], [#allocation10] }
  0x32   : > { %s166_s4 = scalar_lea.vmem [#allocation2], %s764_s18  ;;  %s1110_s7 = smov 512  }
  0x33   : > { %s187_s5 = sshll.u32 %s166_s4, 4  ;;  %s179_s6 = sld [smem:[%s867_s30]]   ;;  %s188_s5 = int_to_ptr.vmem [resolvable:$true] %s187_s5 }
  0x34   : > { %868 = sst [smem:[#allocation9]] (%p1179_p4), %s1110_s7  ;;  %s1111_s8 = smov 256  }
  0x35   : > { %869 = sst [smem:[#allocation9 + $0x1]] (%p1179_p4), %s1111_s8  ;;  %s1112_s9 = smov 2  }
  0x36   : > { %870 = sst [smem:[#allocation9 + $0x2]] (%p1179_p4), %s1112_s9  ;;  %s1113_s1 = smov 128  }
  0x37   : > { %871 = sst [smem:[#allocation9 + $0x3]] (%p1179_p4), %s1113_s1  ;;  %s1114_s18 = smov 8  }
  0x38   : > { %872 = sst [smem:[#allocation9 + $0x4]] (%p1179_p4), %s1113_s1  ;;  %s163_s21 = scalar_lea.sflag [#allocation3], %s162_s10 }
  0x39   : > { %s768_s11 = sshll.u32 %s179_s6, 26  ;;  %873 = sst [smem:[#allocation9 + $0x5]] (%p1179_p4), %s1114_s18 }
  0x3a   : > { %s769_s19 = sadd.s32 134217728, %s768_s11  ;;  %s1115_s30 = smov 131072  }
  0x3b   : > { %874 = dma.general (%p1179_p4), %s174_s24, 512, %s188_s5, %s163_s21, %s1115_s30, [#allocation9], %s769_s19, 0  }
  0x3c PF: > { %212 = sbr.rel (%p1208_p0) target bundleno = 349 (0x15d), region = 32  ;;  %s1246_s4 = sand.u32 (!%p1208_p0), 1, %s1089_s13  }
  0x3d   : > { %s771_s1 = sshll.u32 (!%p1208_p0), %s1246_s4, 5  ;;  %s215_s6 = scalar_lea.sflag (!%p1208_p0), [#allocation3], %s1246_s4 }
  0x3e   : > { %s1250_s7 = scalar_lea.vmem (!%p1208_p0), [#allocation2], %s771_s1  ;;  %p1339_p8 = scmp.ne.s32.totalorder (!%p1208_p0), %s1334_s25, 0 }
  0x41   : > { %1072 = dma.done.wait (%p1339_p8), %s215_s6, 512  }
  0x42   : > { %1074 = vsyncadd (%p1339_p8), %s215_s6, 4294966784 }
  0x43   : > { %1076 = dma.done.wait (%p1183_p5), [#allocation6], 4096  }
  0x44   : > { %1078 = vsyncadd (%p1183_p5), [#allocation6], 4294963200  ;;  %v949_v0 = vld [vmem:[#allocation5 + $0x78] sm:$0xff]   ;;  %v953_v4 = vld [vmem:[#allocation5 + $0x70] sm:$0xff]   ;;  %s773_s22 = sshll.u32 %s1246_s4, 1  ;;  %v1116_v36 = vmov 0.0  }
  0x45   : > { %v950_v1 = vld [vmem:[#allocation5 + $0xf8] sm:$0xff]   ;;  %821 = vmatprep.subr.bf16.mxu0 %v949_v0  ;;  %v954_v5 = vld [vmem:[#allocation5 + $0xf0] sm:$0xff]   ;;  %v957_v8 = vld [vmem:[#allocation5 + $0x68] sm:$0xff]   ;;  %s1265_s23 = scalar_lea.vmem [#allocation7], %s773_s22  ;;  %s816_s5 = sshll.u32 %s1097_s15, 5 }
  0x46   : > { %v951_v2 = vld [vmem:[#allocation5 + $0x38] sm:$0xff]   ;;  %843 = vmatprep.subr.bf16.mxu1 %v950_v1  ;;  %v955_v6 = vld [vmem:[#allocation5 + $0x30] sm:$0xff]   ;;  %v958_v9 = vld [vmem:[#allocation5 + $0xe8] sm:$0xff]   ;;  %252 = vst [vmem:[%s1265_s23] sm:$0x3] %v1116_v36  ;;  %s670_s8 = sshll.u32 %s1265_s23, 4  ;;  %s1281_s18 = scalar_lea.hbm %s1328_s3, %s816_s5  ;;  %s671_s8 = int_to_ptr.vmem [resolvable:$true] %s670_s8 }
  0x47   : > { %v952_v3 = vld [vmem:[#allocation5 + $0xb8] sm:$0xff]   ;;  %822 = vmatpush3.bf16.msra.mxu0 %v951_v2  ;;  %v956_v7 = vld [vmem:[#allocation5 + $0xb0] sm:$0xff]   ;;  %v959_v10 = vld [vmem:[#allocation5 + $0x28] sm:$0xff]   ;;  %s657_s19 = scalar_lea.sflag [#allocation4], %s1246_s4  ;;  %s1021_s21 = scalar_lea.vmem %s671_s8, 32 }
  0x48   : > { %844 = vmatpush3.bf16.msra.mxu1 %v952_v3  ;;  %823 = vmatprep.subr.bf16.mxu0 %v953_v4  ;;  %v960_v11 = vld [vmem:[#allocation5 + $0xa8] sm:$0xff]   ;;  %v961_v12 = vld [vmem:[#allocation5 + $0x60] sm:$0xff]   ;;  %v965_v16 = vld [vmem:[#allocation5 + $0x58] sm:$0xff]   ;;  %p1022_p4 = scmp.ne.s32.totalorder %s671_s8, %s1021_s21  ;;  %p1340_p5 = scmp.ne.s32.totalorder %s1335_s26, 0 }
  0x49   : > { %845 = vmatprep.subr.bf16.mxu1 %v954_v5  ;;  %v962_v13 = vld [vmem:[#allocation5 + $0xe0] sm:$0xff]   ;;  %v966_v17 = vld [vmem:[#allocation5 + $0xd8] sm:$0xff]   ;;  %v969_v20 = vld [vmem:[#allocation5 + $0x50] sm:$0xff]   ;;  %s1117_s30 = smov [#allocation7]  }
  0x4a   : > { %v963_v14 = vld [vmem:[#allocation5 + $0x20] sm:$0xff]   ;;  %v967_v18 = vld [vmem:[#allocation5 + $0x18] sm:$0xff]   ;;  %v970_v21 = vld [vmem:[#allocation5 + $0xd0] sm:$0xff]   ;;  %p1023_p9 = pnand %p1022_p4, %p1340_p5  ;;  %s1025_s15 = sshll.u32 %s1117_s30, 4  ;;  %s1026_s15 = int_to_ptr.vmem [resolvable:$false] %s1025_s15 }
  0x4b   : > { %824 = vmatpush3.bf16.msra.mxu0 %v955_v6  ;;  %v964_v15 = vld [vmem:[#allocation5 + $0xa0] sm:$0xff]   ;;  %v968_v19 = vld [vmem:[#allocation5 + $0x98] sm:$0xff]   ;;  %v971_v22 = vld [vmem:[#allocation5 + $0x10] sm:$0xff]   ;;  %s1027_s1 = scalar_lea.vmem %s1026_s15, 64  ;;  %p1028_p0 = scmp.lt.s32.totalorder %s671_s8, %s1026_s15 }
  0x4c   : > { %846 = vmatpush3.bf16.msra.mxu1 %v956_v7  ;;  %825 = vmatprep.subr.bf16.mxu0 %v957_v8  ;;  %v972_v23 = vld [vmem:[#allocation5 + $0x90] sm:$0xff]   ;;  %v973_v24 = vld [vmem:[#allocation5 + $0x48] sm:$0xff]   ;;  %v977_v28 = vld [vmem:[#allocation5 + $0x40] sm:$0xff]   ;;  %p1024_p11 = pneg %p1023_p9  ;;  %p1029_p1 = scmp.lt.s32.totalorder %s1027_s1, %s1021_s21 }
  0x4d   : > { %847 = vmatprep.subr.bf16.mxu1 %v958_v9  ;;  %v974_v25 = vld [vmem:[#allocation5 + $0xc8] sm:$0xff]   ;;  %v978_v29 = vld [vmem:[#allocation5 + $0xc0] sm:$0xff]   ;;  %v984_v34 = vld [vmem:[%s1250_s7 + $0x10] ss:$8 sps:$4 sm:$0xff]  }
  0x4e   : > { %v975_v26 = vld [vmem:[#allocation5 + $0x8] sm:$0xff]   ;;  %v979_v30 = vld [vmem:[#allocation5] sm:$0xff]   ;;  %v986_v35 = vld [vmem:[%s1250_s7 + $0x14] ss:$8 sps:$4 sm:$0xff]   ;;  %p1030_p2 = por %p1029_p1, %p1028_p0 }
  0x4f   : > { %826 = vmatpush3.bf16.msra.mxu0 %v959_v10  ;;  %v976_v27 = vld [vmem:[#allocation5 + $0x88] sm:$0xff]   ;;  %v980_v31 = vld [vmem:[#allocation5 + $0x80] sm:$0xff]   ;;  %635 = vmatprep.mubr.bf16.mxu1 %v986_v35 }
  0x50   : > { %848 = vmatpush3.bf16.msra.mxu1 %v960_v11  ;;  %827 = vmatprep.subr.bf16.mxu0 %v961_v12  ;;  %v981_v32 = vld [vmem:[%s1250_s7] ss:$8 sps:$4 sm:$0xff]   ;;  %v983_v33 = vld [vmem:[%s1250_s7 + $0x4] ss:$8 sps:$4 sm:$0xff]   ;;  %p1031_p6 = pnand %p1030_p2, %p1024_p11 }
  0x51   : > { %849 = vmatprep.subr.bf16.mxu1 %v962_v13  ;;  %432 = vmatprep.mubr.bf16.mxu0 %v983_v33  ;;  %v774_v39 = vld [vmem:[%s1327_s2] ss:$0 sm:$0xff]  ;;  %v796_v42 = vld [vmem:[%s1327_s2 + $0x1] ss:$0 sm:$0xff] }
  0x52   : > { %v443_v6 = vld [vmem:[%s1265_s23] sm:$0x1]  ;;  %v646_v9 = vld [vmem:[%s1265_s23 + $0x1] sm:$0x1] }
  0x53   : > { %828 = vmatpush3.bf16.msra.mxu0 %v963_v14 }
  0x54   : > { %850 = vmatpush3.bf16.msra.mxu1 %v964_v15  ;;  %829 = vmatprep.subr.bf16.mxu0 %v965_v16 }
  0x55   : > { %851 = vmatprep.subr.bf16.mxu1 %v966_v17 }
  0x57   : > { %830 = vmatpush3.bf16.msra.mxu0 %v967_v18 }
  0x58   : > { %852 = vmatpush3.bf16.msra.mxu1 %v968_v19  ;;  %831 = vmatprep.subr.bf16.mxu0 %v969_v20 }
  0x59   : > { %853 = vmatprep.subr.bf16.mxu1 %v970_v21 }
  0x5b   : > { %832 = vmatpush3.bf16.msra.mxu0 %v971_v22 }
  0x5c   : > { %854 = vmatpush3.bf16.msra.mxu1 %v972_v23  ;;  %833 = vmatprep.subr.bf16.mxu0 %v973_v24 }
  0x5d   : > { %855 = vmatprep.subr.bf16.mxu1 %v974_v25 }
  0x5f   : > { %834 = vmatpush3.bf16.msra.mxu0 %v975_v26 }
  0x60   : > { %856 = vmatpush3.bf16.msra.mxu1 %v976_v27  ;;  %835 = vmatprep.subr.bf16.mxu0 %v977_v28 }
  0x61   : > { %857 = vmatprep.subr.bf16.mxu1 %v978_v29 }
  0x63   : > { %836 = vmatpush3.bf16.msra.mxu0 %v979_v30 }
  0x64   : > { %858 = vmatpush3.bf16.msra.mxu1 %v980_v31 }
  0x66   : > { %433 = vmatmul.mubr.bf16.vlgmr.msra.gmra.mxu0 %v981_v32 }
  0x67   : > { %636 = vmatmul.mubr.bf16.vlgmr.msra.gmra.mxu1 %v984_v34 }
 0x126   : > { %v837_v37 = vpop.f32.mrf.mxu0 }
 0x127   : > { %v859_v38 = vpop.f32.mrf.mxu1 }
 0x128   : > { %v838_v40 = vpop.f32.mrf.mxu0 }
 0x129   : > { %v839_v41 = vadd.f32 %v838_v40, %v837_v37  ;;  %v860_v43 = vpop.f32.mrf.mxu1 }
 0x12a   : > { %v861_v44 = vadd.f32 %v860_v43, %v859_v38  ;;  %v840_v45 = vpop.f32.mrf.mxu0 }
 0x12b   : > { %v435_v46 = vadd.f32 %v839_v41, %v774_v39  ;;  %v862_v47 = vpop.f32.mrf.mxu1 }
 0x12c   : > { %v638_v48 = vadd.f32 %v861_v44, %v796_v42  ;;  %v841_v49 = vpop.f32.mrf.mxu0 }
 0x12d   : > { %v842_v50 = vadd.f32 %v841_v49, %v840_v45  ;;  %v863_v51 = vpop.f32.mrf.mxu1  ;;  %987 = vtanh.f32 %v435_v46 }
 0x12e   : > { %v864_v52 = vadd.f32 %v863_v51, %v862_v47  ;;  %989 = vtanh.f32 %v638_v48 }
 0x12f   : > { %v438_v53 = vadd.f32 %v842_v50, %v774_v39 }
 0x130   : > { %v641_v54 = vadd.f32 %v864_v52, %v796_v42 }
 0x131   : > { %991 = vtanh.f32 %v438_v53 }
 0x132   : > { %993 = vtanh.f32 %v641_v54 }
 0x13a   : > { %v988_v55 = vpop.eup %987 }
 0x13b   : > { %v990_v56 = vpop.eup %989 }
 0x13e   : > { %v992_v57 = vpop.eup %991 }
 0x13f   : > { %v994_v58 = vpop.eup %993  ;;  %v444_v59 = vadd.f32 %v992_v57, %v988_v55 }
 0x140   : > { %v647_v60 = vadd.f32 %v994_v58, %v990_v56 }
 0x141   : > { %v445_v61 = vrot.slane %v444_v59, 4 }
 0x142   : > { %v648_v62 = vrot.slane %v647_v60, 4 }
 0x143   : > { %v446_v63 = vadd.f32 %v445_v61, %v444_v59 }
 0x144   : > { %v649_v0 = vadd.f32 %v648_v62, %v647_v60 }
 0x145   : > { %v447_v1 = vrot.slane %v446_v63, 2 }
 0x146   : > { %v650_v2 = vrot.slane %v649_v0, 2 }
 0x147   : > { %v448_v3 = vadd.f32 %v447_v1, %v446_v63 }
 0x148   : > { %v651_v4 = vadd.f32 %v650_v2, %v649_v0 }
 0x149   : > { %v449_v5 = vrot.slane %v448_v3, 1 }
 0x14a   : > { %v652_v7 = vrot.slane %v651_v4, 1 }
 0x14b   : > { %v450_v8 = vadd.f32 %v449_v5, %v448_v3 }
 0x14c   : > { %v653_v10 = vadd.f32 %v652_v7, %v651_v4 }
 0x14d   : > { %v451_v11 = vadd.f32 %v450_v8, %v443_v6 }
 0x14e   : > { %v654_v12 = vadd.f32 %v653_v10, %v646_v9 }
 0x14f   : > { %452 = vst [vmem:[%s1265_s23] sm:$0x1] %v451_v11 }
 0x150   : > { %655 = vst [vmem:[%s1265_s23 + $0x1] sm:$0x1] %v654_v12 }
 0x151   : > { %1034 = shalt.err (!%p1031_p6)
}
 0x152   : > { %s1035_s6 = scalar_lea.hbm %s1281_s18, 32  ;;  %s1039_s22 = scalar_lea.hbm %s1328_s3, 64 }
 0x153   : > { %p1036_p3 = scmp.ne.s32.totalorder %s1281_s18, %s1035_s6  ;;  %p1040_p12 = scmp.lt.s32.totalorder %s1281_s18, %s1328_s3 }
 0x154   : > { %p1041_p8 = scmp.lt.s32.totalorder %s1039_s22, %s1035_s6 }
 0x155   : > { %p1037_p7 = pnand %p1036_p3, %p1340_p5 }
 0x156   : > { %p1042_p4 = por %p1041_p8, %p1040_p12 }
 0x157   : > { %p1038_p10 = pneg %p1037_p7 }
 0x159   : > { %p1043_p9 = pnand %p1042_p4, %p1038_p10 }
 0x15b   : > { %1046 = shalt.err (!%p1043_p9)
}
 0x15c   : > { %878 = dma.vmem_to_hbm [thread:$0]  (%p1340_p5), %s671_s8, 32, %s1281_s18, %s657_s19  }
 0x15d PF: > { %s682_s29 = sand.u32 1, %s1085_s12   ;;  %p1341_p11 = scmp.ne.s32.totalorder %s1336_s28, 0 }
 0x15e   : > { %s683_s10 = scalar_lea.sflag [#allocation4], %s682_s29 }
 0x15f   : > { %p885_p0 = pnand %p763_p13, %p1341_p11 }
 0x161   : > { %p886_p1 = pneg %p885_p0 }
 0x163   : > { %1080 = dma.done.wait (%p886_p1), %s683_s10, 32  }
 0x164   : > { %1082 = vsyncadd (%p886_p1), %s683_s10, 4294967264  ;;  %s20_s17 = sadd.s32 1, %s1105_s17   ;;  %s1342_s12 = smov %s1089_s13 }
 0x165   : > { %p17_p2 = scmp.ge.s32.totalorder %s20_s17, 4   ;;  %s1343_s13 = smov %s1093_s14 }
 0x166   : > { %s1344_s14 = smov %s1200_s27  ;;  %s1345_s15 = smov %s1101_s16 }
 0x167   : > { %s1346_s16 = smov %s1348_s20  ;;  %19 = sbr.rel (!%p17_p2) target bundleno = 9 (0x9), region = 93 }
 0x16c   :  { %688 = vsyncpa [#allocation3], 1 }
 0x16d   :  { %690 = vsyncpa [#allocation3 + $0x1], 1 }
 0x16e   :  { %691 = vsyncpa [#allocation6], 1 }
 0x16f   :  { %692 = vsyncpa [#allocation4], 1 }
 0x170   :  { %694 = vsyncpa [#allocation4 + $0x1], 1 }

</bundles_post_ra>
